<compile_context>
chip_gen: v6e
topology: v6e:2x2x1
jax: 0.10.0
libtpu: 0.0.40
codegen_flags: <defaults>
</compile_context>

<pallas_src>
import jax
import jax.numpy as jnp
from jax.experimental import pallas as pl
from jax.experimental.pallas import tpu as pltpu

_LANES = 128  # vreg lane width; last dim of every block is a full multiple of this.


def _tanh_add_kernel(x_ref, h_ref, o_ref):
    # Add on the VPU, tanh on the EUP (its own VLIW slot -> hidden under DMA traffic).
    o_ref[...] = jnp.tanh(x_ref[...] + h_ref[...])


def mycell_forward(x: jax.Array, h: jax.Array, *, max_block_rows: int = 1024) -> jax.Array:
    """new_h = tanh(x + h), for any (identical) shape of x and h."""
    assert x.shape == h.shape and x.dtype == h.dtype
    orig_shape = x.shape
    n = x.size

    # Lane-dense layout: flatten -> (rows, 128). Rows padded so block_rows | rows.
    rows = pl.cdiv(n, _LANES)
    block_rows = min(max_block_rows, pl.cdiv(rows, 8) * 8)  # multiple of 8 sublanes
    padded_rows = pl.cdiv(rows, block_rows) * block_rows
    padded_n = padded_rows * _LANES

    def to_slab(a):
        flat = a.reshape(-1)
        if padded_n != n:
            flat = jnp.pad(flat, (0, padded_n - n))
        return flat.reshape(padded_rows, _LANES)

    x2 = to_slab(x)
    h2 = to_slab(h)

    out2 = pl.pallas_call(
        _tanh_add_kernel,
        out_shape=jax.ShapeDtypeStruct((padded_rows, _LANES), x.dtype),
        grid=(padded_rows // block_rows,),
        in_specs=[
            pl.BlockSpec((block_rows, _LANES), lambda i: (i, 0)),
            pl.BlockSpec((block_rows, _LANES), lambda i: (i, 0)),
        ],
        out_specs=pl.BlockSpec((block_rows, _LANES), lambda i: (i, 0)),
        # In-place hidden-state update: output reuses the (padded) h buffer.
        input_output_aliases={1: 0},
        compiler_params=pltpu.CompilerParams(
            dimension_semantics=("parallel",),  # shards rows across both TCs on v7x
        ),
    )(x2, h2)

    return out2.reshape(-1)[:n].reshape(orig_shape)


if __name__ == "__main__":
    key = jax.random.PRNGKey(0)
    kx, kh, kbx, kbh = jax.random.split(key, 4)

    # Spec shapes: x, h = torch.rand(3, 4)
    x = jax.random.uniform(kx, (3, 4), dtype=jnp.float32)
    h = jax.random.uniform(kh, (3, 4), dtype=jnp.float32)

    new_h = mycell_forward(x, h)
    jax.block_until_ready(new_h)
    ref = jnp.tanh(x + h)
    assert new_h.shape == (3, 4)
    assert jnp.allclose(new_h, ref, atol=1e-5, rtol=1e-5)

    # Batched sanity check: odd shape + small block_rows forces padding and a
    # multi-step parallel grid (exercises the tiled path the review asked for).
    xb = jax.random.uniform(kbx, (40, 333), dtype=jnp.float32)
    hb = jax.random.uniform(kbh, (40, 333), dtype=jnp.float32)
    new_hb = mycell_forward(xb, hb, max_block_rows=16)
    jax.block_until_ready(new_hb)
    refb = jnp.tanh(xb + hb)
    assert new_hb.shape == xb.shape
    assert jnp.allclose(new_hb, refb, atol=1e-5, rtol=1e-5)

    print("KERNEL_OK")
</pallas_src>

<mosaic_0001>
module attributes {stable_mosaic.version = 11 : i64} {
  func.func @_tanh_add_kernel(%arg0: i32, %arg1: memref<8x128xf32, #tpu.memory_space<vmem>>, %arg2: memref<8x128xf32, #tpu.memory_space<vmem>>, %arg3: memref<8x128xf32, #tpu.memory_space<vmem>>) attributes {dimension_semantics = [#tpu.dimension_semantics<parallel>], iteration_bounds = array<i64: 1>, scalar_prefetch = 0 : i64, scratch_operands = 0 : i64, tpu.core_type = #tpu.core_type<tc>, window_params = [{transform_indices = @transform_0, window_bounds = array<i64: 8, 128>}, {transform_indices = @transform_1, window_bounds = array<i64: 8, 128>}, {transform_indices = @transform_2, window_bounds = array<i64: 8, 128>}]} {
    %c0 = arith.constant 0 : index
    %c0_0 = arith.constant 0 : index
    %0 = vector.load %arg1[%c0, %c0_0] : memref<8x128xf32, #tpu.memory_space<vmem>>, vector<8x128xf32>
    %c0_1 = arith.constant 0 : index
    %c0_2 = arith.constant 0 : index
    %1 = vector.load %arg2[%c0_1, %c0_2] : memref<8x128xf32, #tpu.memory_space<vmem>>, vector<8x128xf32>
    %2 = arith.addf %0, %1 : vector<8x128xf32>
    %3 = math.tanh %2 : vector<8x128xf32>
    %c0_3 = arith.constant 0 : index
    %c0_4 = arith.constant 0 : index
    %4 = vector.load %arg3[%c0_3, %c0_4] : memref<8x128xf32, #tpu.memory_space<vmem>>, vector<8x128xf32>
    tpu.vector_store %arg3[%c0_3, %c0_4], %3 {strides = array<i32>} : memref<8x128xf32, #tpu.memory_space<vmem>>, vector<8x128xf32>,
    return
  }
  func.func @transform_0(%arg0: i32) -> (i32, i32) {
    %c0_i32 = arith.constant 0 : i32
    %c0_i32_0 = arith.constant 0 : i32
    return %arg0, %c0_i32 : i32, i32
  }
  func.func @transform_1(%arg0: i32) -> (i32, i32) {
    %c0_i32 = arith.constant 0 : i32
    %c0_i32_0 = arith.constant 0 : i32
    return %arg0, %c0_i32 : i32, i32
  }
  func.func @transform_2(%arg0: i32) -> (i32, i32) {
    %c0_i32 = arith.constant 0 : i32
    %c0_i32_0 = arith.constant 0 : i32
    return %arg0, %c0_i32 : i32, i32
  }
}

</mosaic_0001>

<bundles_post_ra>
// kernel: tpu_custom_call.1
= control target key start
LH: loop header
LB: loop body
LE: loop exit
PB: predicated region body
PF: predicated region fallthrough
CT: control target
= control target key end

     0   :  { %7 = vsyncpa [#allocation3], 0  ;;  %s118_s0 = inlined_call_operand.vmem [shape: f32[8,128], index: 0, kind: input, shape index: {}]   ;;  %s119_s1 = inlined_call_operand.hbm [shape: f32[8,128], index: 1, kind: input, shape index: {}, may-alias: {1,2}]   ;;  %s120_s2 = inlined_call_operand.hbm [shape: f32[8,128], index: 2, kind: output, shape index: {}, may-alias: {1,2}]  }
   0x1   :  { %8 = vsyncpa [#allocation4], 0  ;;  %s92_s9 = smov [#allocation2]  }
   0x2   :  { %s17_s10 = sshll.u32 %s92_s9, 4  ;;  %s18_s10 = int_to_ptr.vmem [resolvable:$true] %s17_s10 }
   0x3   :  { %s56_s11 = scalar_lea.vmem %s18_s10, 128  ;;  %p61_p1 = scmp.lt.s32.totalorder %s18_s10, %s18_s10 }
   0x4   :  { %p57_p0 = scmp.ne.s32.totalorder %s18_s10, %s56_s11  ;;  %p62_p2 = scmp.lt.s32.totalorder %s56_s11, %s56_s11 }
   0x6   :  { %p63_p3 = por %p62_p2, %p61_p1 }
   0x8   :  { %p64_p4 = pnand %p63_p3, %p57_p0 }
   0xa   :  { %67 = shalt.err (!%p64_p4)
}
   0xb   :  { %20 = dma.hbm_to_vmem [thread:$0]  %s119_s1, 128, %s18_s10, [#allocation3]  }
   0xc   :  { %88 = dma.done.wait [#allocation3], 128  }
   0xd   :  { %89 = vsyncadd [#allocation3], 4294967168  ;;  %v24_v0 = vld [vmem:[%s118_s0] sm:$0xff]  ;;  %s93_s16 = smov [#allocation5]  }
   0xe   :  { %v25_v1 = vld [vmem:[#allocation2] sm:$0xff]  ;;  %s35_s17 = sshll.u32 %s93_s16, 4  ;;  %s36_s17 = int_to_ptr.vmem [resolvable:$true] %s35_s17 }
   0xf   :  { %v26_v2 = vadd.f32 %v25_v1, %v24_v0  ;;  %s68_s18 = scalar_lea.vmem %s36_s17, 128  ;;  %p73_p6 = scmp.lt.s32.totalorder %s36_s17, %s36_s17 }
  0x10   :  { %p69_p5 = scmp.ne.s32.totalorder %s36_s17, %s68_s18  ;;  %p74_p7 = scmp.lt.s32.totalorder %s68_s18, %s68_s18 }
  0x11   :  { %46 = vtanh.f32 %v26_v2 }
  0x12   :  { %p75_p8 = por %p74_p7, %p73_p6 }
  0x14   :  { %p76_p9 = pnand %p75_p8, %p69_p5 }
  0x1e   :  { %v47_v3 = vpop.eup %46 }
  0x1f   :  { %28 = vst [vmem:[#allocation5] sm:$0xff] %v47_v3 }
  0x20   :  { %79 = shalt.err (!%p76_p9)
}
  0x21   :  { %38 = dma.vmem_to_hbm [thread:$0]  %s36_s17, 128, %s120_s2, [#allocation4]  }
  0x22   :  { %90 = dma.done.wait [#allocation4], 128  }
  0x23   :  { %91 = vsyncadd [#allocation4], 4294967168 }
  0x24   :  { %42 = vsyncpa [#allocation3], 1 }
  0x25   :  { %43 = vsyncpa [#allocation4], 1 }

</bundles_post_ra>
